<compile_context>
chip_gen: v7x
topology: tpu7x:2x2x1
jax: 0.10.0
libtpu: 0.0.40
codegen_flags: <defaults>
</compile_context>

<pallas_src>
import functools
import math

import jax
import jax.numpy as jnp
from jax.experimental import pallas as pl
from jax.experimental.pallas import tpu as pltpu


# ----------------------------------------------------------------------------
# small helpers
# ----------------------------------------------------------------------------
def _fit(dim, target):
    """Largest tile <= target that evenly divides `dim`.

    Real DiT shapes should pass 128/256-aligned targets (they divide evenly);
    at the demo shapes this simply returns the full dimension."""
    t = min(dim, target)
    while dim % t:
        t -= 1
    return t


def _ln_rows(x, w, b, eps):
    """LayerNorm over the last axis; w/b are (1, D) and broadcast over rows."""
    mu = jnp.mean(x, axis=-1, keepdims=True)
    var = jnp.mean(jnp.square(x - mu), axis=-1, keepdims=True)
    return (x - mu) * jax.lax.rsqrt(var + eps) * w + b


# ----------------------------------------------------------------------------
# Tiled matmul (used for wo)
# ----------------------------------------------------------------------------
def _matmul_kernel(a_ref, b_ref, o_ref, acc_ref):
    @pl.when(pl.program_id(2) == 0)
    def _():
        acc_ref[...] = jnp.zeros_like(acc_ref)

    acc_ref[...] += jnp.dot(a_ref[...], b_ref[...],
                            preferred_element_type=jnp.float32)

    @pl.when(pl.program_id(2) == pl.num_programs(2) - 1)
    def _():
        o_ref[...] = acc_ref[...].astype(o_ref.dtype)


def matmul_pallas(a, b, *, tm=256, tn=256, tk=512, out_dtype=None):
    """a: (M, K) @ b: (K, N) -> (M, N), tiled/pipelined with a f32 VMEM accumulator."""
    M, K = a.shape
    N = b.shape[1]
    out_dtype = out_dtype or a.dtype
    tm, tn, tk = _fit(M, tm), _fit(N, tn), _fit(K, tk)
    return pl.pallas_call(
        _matmul_kernel,
        out_shape=jax.ShapeDtypeStruct((M, N), out_dtype),
        grid=(M // tm, N // tn, K // tk),
        in_specs=[
            pl.BlockSpec((tm, tk), lambda i, j, k: (i, k)),
            pl.BlockSpec((tk, tn), lambda i, j, k: (k, j)),
        ],
        out_specs=pl.BlockSpec((tm, tn), lambda i, j, k: (i, j)),
        scratch_shapes=[pltpu.VMEM((tm, tn), jnp.float32)],
        compiler_params=pltpu.CompilerParams(
            dimension_semantics=("parallel", "parallel", "arbitrary")),
    )(a, b)


# ----------------------------------------------------------------------------
# Fused QKV projection + q/k LayerNorm epilogue
# ----------------------------------------------------------------------------
def _qkv_ln_kernel(x_ref, w_ref, qw_ref, qb_ref, kw_ref, kb_ref,
                   q_out, k_out, v_out, acc_ref, *, hd_total, eps):
    @pl.when(pl.program_id(1) == 0)
    def _():
        acc_ref[...] = jnp.zeros_like(acc_ref)

    acc_ref[...] += jnp.dot(x_ref[...], w_ref[...],
                            preferred_element_type=jnp.float32)

    @pl.when(pl.program_id(1) == pl.num_programs(1) - 1)
    def _():
        acc = acc_ref[...]
        q = acc[:, :hd_total]
        k = acc[:, hd_total:2 * hd_total]
        v = acc[:, 2 * hd_total:]
        q_out[...] = _ln_rows(q, qw_ref[...], qb_ref[...], eps).astype(q_out.dtype)
        k_out[...] = _ln_rows(k, kw_ref[...], kb_ref[...], eps).astype(k_out.dtype)
        v_out[...] = v.astype(v_out.dtype)


def qkv_ln_pallas(x, w_qkv, q_w, q_b, k_w, k_b, hd_total, *,
                  tm=256, tk=512, eps=1e-5):
    """x: (M, dim) @ w_qkv: (dim, 3*HD) -> (xq, xk, xv) each (M, HD), with q/k LayerNorm."""
    M, K = x.shape
    N = w_qkv.shape[1]                    # == 3 * hd_total
    tm, tk = _fit(M, tm), _fit(K, tk)
    kernel = functools.partial(_qkv_ln_kernel, hd_total=hd_total, eps=eps)
    out_sds = jax.ShapeDtypeStruct((M, hd_total), x.dtype)
    ln_spec = pl.BlockSpec((1, hd_total), lambda i, k: (0, 0))
    out_spec = pl.BlockSpec((tm, hd_total), lambda i, k: (i, 0))
    return pl.pallas_call(
        kernel,
        out_shape=(out_sds, out_sds, out_sds),
        grid=(M // tm, K // tk),
        in_specs=[
            pl.BlockSpec((tm, tk), lambda i, k: (i, k)),
            pl.BlockSpec((tk, N), lambda i, k: (k, 0)),
            ln_spec, ln_spec, ln_spec, ln_spec,
        ],
        out_specs=(out_spec, out_spec, out_spec),
        scratch_shapes=[pltpu.VMEM((tm, N), jnp.float32)],
        compiler_params=pltpu.CompilerParams(
            dimension_semantics=("parallel", "arbitrary")),
    )(x, w_qkv,
      q_w.reshape(1, -1), q_b.reshape(1, -1),
      k_w.reshape(1, -1), k_b.reshape(1, -1))


# ----------------------------------------------------------------------------
# Fused cross K/V projection + ky LayerNorm epilogue
# ----------------------------------------------------------------------------
def _kvy_ln_kernel(y_ref, w_ref, kw_ref, kb_ref, k_out, v_out, acc_ref,
                   *, hd_total, eps):
    @pl.when(pl.program_id(1) == 0)
    def _():
        acc_ref[...] = jnp.zeros_like(acc_ref)

    acc_ref[...] += jnp.dot(y_ref[...], w_ref[...],
                            preferred_element_type=jnp.float32)

    @pl.when(pl.program_id(1) == pl.num_programs(1) - 1)
    def _():
        acc = acc_ref[...]
        k = acc[:, :hd_total]
        v = acc[:, hd_total:]
        k_out[...] = _ln_rows(k, kw_ref[...], kb_ref[...], eps).astype(k_out.dtype)
        v_out[...] = v.astype(v_out.dtype)


def kvy_ln_pallas(y, w_kv, k_w, k_b, hd_total, *, tm=256, tk=512, eps=1e-5):
    """y: (M, y_dim) @ w_kv: (y_dim, 2*HD) -> (yk, yv) each (M, HD), with ky LayerNorm."""
    M, K = y.shape
    N = w_kv.shape[1]                     # == 2 * hd_total
    tm, tk = _fit(M, tm), _fit(K, tk)
    kernel = functools.partial(_kvy_ln_kernel, hd_total=hd_total, eps=eps)
    out_sds = jax.ShapeDtypeStruct((M, hd_total), y.dtype)
    ln_spec = pl.BlockSpec((1, hd_total), lambda i, k: (0, 0))
    out_spec = pl.BlockSpec((tm, hd_total), lambda i, k: (i, 0))
    return pl.pallas_call(
        kernel,
        out_shape=(out_sds, out_sds),
        grid=(M // tm, K // tk),
        in_specs=[
            pl.BlockSpec((tm, tk), lambda i, k: (i, k)),
            pl.BlockSpec((tk, N), lambda i, k: (k, 0)),
            ln_spec, ln_spec,
        ],
        out_specs=(out_spec, out_spec),
        scratch_shapes=[pltpu.VMEM((tm, N), jnp.float32)],
        compiler_params=pltpu.CompilerParams(
            dimension_semantics=("parallel", "arbitrary")),
    )(y, w_kv, k_w.reshape(1, -1), k_b.reshape(1, -1))


# ----------------------------------------------------------------------------
# Flash attention (online softmax over a KV grid axis, heads grouped per step,
# (B, S, H*hd) layout end-to-end -> lane-dense output, no JAX transposes)
# ----------------------------------------------------------------------------
def _init_online_state(m_sc, l_sc, acc_sc):
    m_sc[...] = jnp.full_like(m_sc, -1e30)
    l_sc[...] = jnp.zeros_like(l_sc)
    acc_sc[...] = jnp.zeros_like(acc_sc)


def _online_softmax_step(qb, kb, vb, bias, m_sc, l_sc, acc_sc,
                         n_heads, head_dim, scale):
    """One KV tile of the online-softmax update, looping statically over heads."""
    for h in range(n_heads):
        sl = slice(h * head_dim, (h + 1) * head_dim)
        hs = slice(h, h + 1)
        q_h = qb[:, sl] * scale                              # (tq, hd)
        s = jax.lax.dot_general(q_h, kb[:, sl],
                                (((1,), (1,)), ((), ())),
                                preferred_element_type=jnp.float32)  # (tq, tkv)
        s = s + bias                                         # additive mask bias
        m_prev = m_sc[:, hs]                                 # (tq, 1)
        m_new = jnp.maximum(m_prev, jnp.max(s, axis=-1, keepdims=True))
        alpha = jnp.exp(m_prev - m_new)
        p = jnp.exp(s - m_new)
        l_sc[:, hs] = alpha * l_sc[:, hs] + jnp.sum(p, axis=-1, keepdims=True)
        v_h = vb[:, sl]
        acc_sc[:, sl] = alpha * acc_sc[:, sl] + jnp.dot(
            p.astype(v_h.dtype), v_h, preferred_element_type=jnp.float32)
        m_sc[:, hs] = m_new


def _flash_self_kernel(bias_ref, q_ref, k_ref, v_ref, o_ref,
                       m_sc, l_sc, acc_sc, *, n_heads, head_dim, scale):
    kv = pl.program_id(2)

    @pl.when(kv == 0)
    def _():
        _init_online_state(m_sc, l_sc, acc_sc)

    _online_softmax_step(q_ref[0], k_ref[0], v_ref[0], bias_ref[0],
                         m_sc, l_sc, acc_sc, n_heads, head_dim, scale)

    @pl.when(kv == pl.num_programs(2) - 1)
    def _():
        outs = []
        for h in range(n_heads):
            sl = slice(h * head_dim, (h + 1) * head_dim)
            inv_l = pl.reciprocal(l_sc[:, h:h + 1], approx=True)
            outs.append(acc_sc[:, sl] * inv_l)
        o_ref[...] = jnp.concatenate(outs, axis=-1)[None].astype(o_ref.dtype)


def _flash_cross_kernel(bias_ref, q_ref, k_ref, v_ref, self_ref, gate_ref, o_ref,
                        m_sc, l_sc, acc_sc, *, n_heads, head_dim, scale):
    kv = pl.program_id(2)

    @pl.when(kv == 0)
    def _():
        _init_online_state(m_sc, l_sc, acc_sc)

    _online_softmax_step(q_ref[0], k_ref[0], v_ref[0], bias_ref[0],
                         m_sc, l_sc, acc_sc, n_heads, head_dim, scale)

    @pl.when(kv == pl.num_programs(2) - 1)
    def _():
        gt = jnp.tanh(gate_ref[...])                         # (1, H)
        outs = []
        for h in range(n_heads):
            sl = slice(h * head_dim, (h + 1) * head_dim)
            inv_l = pl.reciprocal(l_sc[:, h:h + 1], approx=True)
            outs.append(acc_sc[:, sl] * inv_l * gt[:, h:h + 1])
        o_y = jnp.concatenate(outs, axis=-1)                 # (tq, H*hd)
        o_ref[...] = (self_ref[0] + o_y)[None].astype(o_ref.dtype)


def flash_attention_pallas(q, k, v, key_mask, scale, n_heads, head_dim, *,
                           tq=256, tkv=256, self_out=None, gate=None):
    """q: (B,S,H*hd), k/v: (B,Sk,H*hd), key_mask: (B,Sk) in {0,1} -> (B,S,H*hd).

    If self_out/gate are given (cross-attention path) the kernel epilogue returns
    self_out + tanh(gate) * attn."""
    B, S, HD = q.shape
    Sk = k.shape[1]
    tq, tkv = _fit(S, tq), _fit(Sk, tkv)
    # additive key bias: 0.0 where attend, -1e30 where masked (one vadd per tile)
    bias = ((key_mask.astype(jnp.float32) - 1.0) * 1e30).reshape(B, 1, Sk)
    grid = (B, S // tq, Sk // tkv)

    in_specs = [
        pl.BlockSpec((1, 1, tkv), lambda b, i, j: (b, 0, j)),
        pl.BlockSpec((1, tq, HD), lambda b, i, j: (b, i, 0)),
        pl.BlockSpec((1, tkv, HD), lambda b, i, j: (b, j, 0)),
        pl.BlockSpec((1, tkv, HD), lambda b, i, j: (b, j, 0)),
    ]
    args = [bias, q, k, v]
    common = dict(n_heads=n_heads, head_dim=head_dim, scale=scale)
    if self_out is None:
        kernel = functools.partial(_flash_self_kernel, **common)
    else:
        kernel = functools.partial(_flash_cross_kernel, **common)
        in_specs += [
            pl.BlockSpec((1, tq, HD), lambda b, i, j: (b, i, 0)),
            pl.BlockSpec((1, n_heads), lambda b, i, j: (0, 0)),
        ]
        args += [self_out, gate.reshape(1, n_heads).astype(jnp.float32)]

    return pl.pallas_call(
        kernel,
        out_shape=jax.ShapeDtypeStruct((B, S, HD), q.dtype),
        grid=grid,
        in_specs=in_specs,
        out_specs=pl.BlockSpec((1, tq, HD), lambda b, i, j: (b, i, 0)),
        scratch_shapes=[
            pltpu.VMEM((tq, n_heads), jnp.float32),   # running max (per head)
            pltpu.VMEM((tq, n_heads), jnp.float32),   # running denominator
            pltpu.VMEM((tq, HD), jnp.float32),        # running output accumulator
        ],
        compiler_params=pltpu.CompilerParams(
            dimension_semantics=("parallel", "parallel", "arbitrary")),
    )(*args)


# ----------------------------------------------------------------------------
# RoPE glue (pure elementwise, tiny) stays in plain JAX
# TODO(synk): fuse RoPE into the QKV-projection epilogue with per-row cos/sin tiles.
# ----------------------------------------------------------------------------
def apply_rotary_emb(x, cos, sin):
    """x: (B, S, H, hd); cos/sin: (S, hd//2). Pairs (2i, 2i+1) = (real, imag)."""
    xr = x[..., 0::2]
    xi = x[..., 1::2]
    c = cos[None, :, None, :]
    s = sin[None, :, None, :]
    o_r = xr * c - xi * s
    o_i = xr * s + xi * c
    return jnp.stack([o_r, o_i], axis=-1).reshape(x.shape)


# ----------------------------------------------------------------------------
# Full forward (mirrors Attention.forward; n_rep == 1)
# ----------------------------------------------------------------------------
def attention_forward(params, x, x_mask, cos, sin, y, y_mask, n_heads, head_dim):
    B, S, dim = x.shape
    H, hd = n_heads, head_dim
    HD = H * hd
    Ly = y.shape[1]

    # fused QKV projection + q/k LayerNorm (single pass over x)
    xf = x.reshape(B * S, dim)
    xq, xk, xv = qkv_ln_pallas(xf, params["w_qkv_t"],
                               params["q_norm_w"], params["q_norm_b"],
                               params["k_norm_w"], params["k_norm_b"], HD)

    # RoPE on the (B,S,H,hd) view; reshapes are free, layout stays (B, S, H*hd).
    xq = apply_rotary_emb(xq.reshape(B, S, H, hd), cos, sin).reshape(B, S, HD)
    xk = apply_rotary_emb(xk.reshape(B, S, H, hd), cos, sin).reshape(B, S, HD)
    xv = xv.reshape(B, S, HD)

    softmax_scale = math.sqrt(1.0 / hd)

    # self-attention (flash / online softmax)
    out_self = flash_attention_pallas(xq, xk, xv, x_mask, softmax_scale, H, hd)

    # cross-attention to y: fused k/v projection + ky LayerNorm, then
    # out_self + tanh(gate) * out_y fused in the attention epilogue.
    yf = y.reshape(B * Ly, -1)
    yk, yv = kvy_ln_pallas(yf, params["w_kvy_t"],
                           params["ky_norm_w"], params["ky_norm_b"], HD)
    yk = yk.reshape(B, Ly, HD)
    yv = yv.reshape(B, Ly, HD)
    out = flash_attention_pallas(xq, yk, yv, y_mask, softmax_scale, H, hd,
                                 self_out=out_self, gate=params["gate"])

    # output projection (tiled matmul); no transposes anywhere.
    out = out.reshape(B * S, HD)
    return matmul_pallas(out, params["wo_t"]).reshape(B, S, dim)


# ----------------------------------------------------------------------------
# Pure-JAX reference (mirrors the PyTorch float32 SDPA branch) for verification
# ----------------------------------------------------------------------------
def _sdpa_ref(q, k, v, key_mask, scale):
    s = jnp.einsum("bhsd,bhtd->bhst", q, k) * scale
    s = jnp.where(key_mask[:, None, None, :] > 0.5, s, -jnp.inf)
    p = jax.nn.softmax(s, axis=-1)
    return jnp.einsum("bhst,bhtd->bhsd", p, v)


def reference_forward(params, x, x_mask, cos, sin, y, y_mask, n_heads, head_dim):
    B, S, dim = x.shape
    H, hd = n_heads, head_dim
    Ly = y.shape[1]

    def ln(z, w, b):
        mu = jnp.mean(z, -1, keepdims=True)
        var = jnp.mean((z - mu) ** 2, -1, keepdims=True)
        return (z - mu) * jax.lax.rsqrt(var + 1e-5) * w + b

    xf = x.reshape(B * S, dim)
    xq = ln(xf @ params["wq_t"], params["q_norm_w"], params["q_norm_b"])
    xk = ln(xf @ params["wk_t"], params["k_norm_w"], params["k_norm_b"])
    xv = xf @ params["wv_t"]
    xq = apply_rotary_emb(xq.reshape(B, S, H, hd), cos, sin)
    xk = apply_rotary_emb(xk.reshape(B, S, H, hd), cos, sin)
    xv = xv.reshape(B, S, H, hd)
    scale = math.sqrt(1.0 / hd)
    q = jnp.transpose(xq, (0, 2, 1, 3))
    out = _sdpa_ref(q, jnp.transpose(xk, (0, 2, 1, 3)),
                    jnp.transpose(xv, (0, 2, 1, 3)), x_mask, scale)
    out = jnp.transpose(out, (0, 2, 1, 3))

    yf = y.reshape(B * Ly, -1)
    yk = ln(yf @ params["wk_y_t"], params["ky_norm_w"], params["ky_norm_b"]).reshape(B, Ly, H, hd)
    yv = (yf @ params["wv_y_t"]).reshape(B, Ly, H, hd)
    out_y = _sdpa_ref(q, jnp.transpose(yk, (0, 2, 1, 3)),
                      jnp.transpose(yv, (0, 2, 1, 3)), y_mask, scale)
    out_y = jnp.transpose(out_y, (0, 2, 1, 3)) * jnp.tanh(params["gate"])[None, None, :, None]
    out = (out + out_y).reshape(B * S, H * hd)
    return (out @ params["wo_t"]).reshape(B, S, dim)


# ----------------------------------------------------------------------------
# Parameter init + driver
# ----------------------------------------------------------------------------
def _xavier(key, in_dim, out_dim):
    bound = math.sqrt(6.0 / (in_dim + out_dim))
    # stored pre-transposed: (in_dim, out_dim), i.e. torch weight.T
    return jax.random.uniform(key, (in_dim, out_dim), jnp.float32, -bound, bound)


if __name__ == "__main__":
    B, S, dim = 2, 16, 32
    n_heads, n_kv_heads = 4, 4
    head_dim = dim // n_heads          # 8
    y_dim, Ly = 16, 8

    key = jax.random.PRNGKey(0)
    ks = jax.random.split(key, 10)

    params = {
        "wq_t": _xavier(ks[0], dim, n_heads * head_dim),
        "wk_t": _xavier(ks[1], dim, n_kv_heads * head_dim),
        "wv_t": _xavier(ks[2], dim, n_kv_heads * head_dim),
        "wk_y_t": _xavier(ks[3], y_dim, n_kv_heads * head_dim),
        "wv_y_t": _xavier(ks[4], y_dim, n_kv_heads * head_dim),
        "wo_t": _xavier(ks[5], n_heads * head_dim, dim),
        "q_norm_w": jnp.ones((n_heads * head_dim,), jnp.float32),
        "q_norm_b": jnp.zeros((n_heads * head_dim,), jnp.float32),
        "k_norm_w": jnp.ones((n_kv_heads * head_dim,), jnp.float32),
        "k_norm_b": jnp.zeros((n_kv_heads * head_dim,), jnp.float32),
        "ky_norm_w": jnp.ones((n_kv_heads * head_dim,), jnp.float32),
        "ky_norm_b": jnp.zeros((n_kv_heads * head_dim,), jnp.float32),
        # PyTorch inits gate to zeros (tanh(0)=0); use a deterministic nonzero here so
        # the cross-attention branch is actually exercised.
        "gate": jnp.full((n_heads,), 0.5, jnp.float32),
    }
    # pre-concatenated weights for the fused projection kernels (weight prep, done once)
    params["w_qkv_t"] = jnp.concatenate(
        [params["wq_t"], params["wk_t"], params["wv_t"]], axis=1)
    params["w_kvy_t"] = jnp.concatenate(
        [params["wk_y_t"], params["wv_y_t"]], axis=1)

    x = jax.random.normal(ks[6], (B, S, dim), jnp.float32)
    y = jax.random.normal(ks[7], (B, Ly, y_dim), jnp.float32)
    # key masks (1 = attend); batch 1 has padding at the tail
    x_mask = jnp.concatenate(
        [jnp.ones((1, S), jnp.float32),
         jnp.concatenate([jnp.ones((1, 12)), jnp.zeros((1, S - 12))], axis=1)], axis=0
    ).astype(jnp.float32)
    y_mask = jnp.concatenate(
        [jnp.ones((1, Ly), jnp.float32),
         jnp.concatenate([jnp.ones((1, 5)), jnp.zeros((1, Ly - 5))], axis=1)], axis=0
    ).astype(jnp.float32)

    # RoPE tables: freqs_cis equivalent of shape (S, head_dim//2)
    theta = 10000.0
    inv_freq = 1.0 / (theta ** (jnp.arange(0, head_dim, 2, dtype=jnp.float32) / head_dim))
    angles = jnp.arange(S, dtype=jnp.float32)[:, None] * inv_freq[None, :]
    cos, sin = jnp.cos(angles), jnp.sin(angles)

    out = attention_forward(params, x, x_mask, cos, sin, y, y_mask, n_heads, head_dim)
    out = jax.block_until_ready(out)

    ref = reference_forward(params, x, x_mask, cos, sin, y, y_mask, n_heads, head_dim)
    assert out.shape == (B, S, dim)
    assert jnp.allclose(out, ref, atol=5e-3, rtol=5e-3), float(jnp.max(jnp.abs(out - ref)))

    print("KERNEL_OK")
</pallas_src>

<mosaic_0001>
module attributes {stable_mosaic.version = 11 : i64} {
  func.func @_qkv_ln_kernel(%arg0: i32, %arg1: i32, %arg2: memref<32x32xf32, #tpu.memory_space<vmem>>, %arg3: memref<32x96xf32, #tpu.memory_space<vmem>>, %arg4: memref<1x32xf32, #tpu.memory_space<vmem>>, %arg5: memref<1x32xf32, #tpu.memory_space<vmem>>, %arg6: memref<1x32xf32, #tpu.memory_space<vmem>>, %arg7: memref<1x32xf32, #tpu.memory_space<vmem>>, %arg8: memref<32x32xf32, #tpu.memory_space<vmem>>, %arg9: memref<32x32xf32, #tpu.memory_space<vmem>>, %arg10: memref<32x32xf32, #tpu.memory_space<vmem>>, %arg11: memref<32x96xf32, #tpu.memory_space<vmem>>) attributes {dimension_semantics = [#tpu.dimension_semantics<parallel>, #tpu.dimension_semantics<arbitrary>], iteration_bounds = array<i64: 1, 1>, scalar_prefetch = 0 : i64, scratch_operands = 1 : i64, tpu.core_type = #tpu.core_type<tc>, window_params = [{transform_indices = @transform_0, window_bounds = array<i64: 32, 32>}, {transform_indices = @transform_1, window_bounds = array<i64: 32, 96>}, {pipeline_mode = #tpu.pipeline_mode<synchronous>, transform_indices = @transform_2, window_bounds = array<i64: 1, 32>}, {pipeline_mode = #tpu.pipeline_mode<synchronous>, transform_indices = @transform_3, window_bounds = array<i64: 1, 32>}, {pipeline_mode = #tpu.pipeline_mode<synchronous>, transform_indices = @transform_4, window_bounds = array<i64: 1, 32>}, {pipeline_mode = #tpu.pipeline_mode<synchronous>, transform_indices = @transform_5, window_bounds = array<i64: 1, 32>}, {transform_indices = @transform_6, window_bounds = array<i64: 32, 32>}, {transform_indices = @transform_7, window_bounds = array<i64: 32, 32>}, {transform_indices = @transform_8, window_bounds = array<i64: 32, 32>}]} {
    %c0_i32 = arith.constant 0 : i32
    %0 = arith.cmpi eq, %arg1, %c0_i32 : i32
    %1 = arith.extui %0 : i1 to i32
    %c0_i32_0 = arith.constant 0 : i32
    %2 = arith.cmpi ne, %1, %c0_i32_0 : i32
    scf.if %2 {
      %cst_10 = arith.constant 0.000000e+00 : f32
      %12 = vector.broadcast %cst_10 : f32 to vector<32x96xf32>
      %c0_11 = arith.constant 0 : index
      %c0_12 = arith.constant 0 : index
      %13 = vector.load %arg11[%c0_11, %c0_12] : memref<32x96xf32, #tpu.memory_space<vmem>>, vector<32x96xf32>
      tpu.vector_store %arg11[%c0_11, %c0_12], %12 {strides = array<i32>} : memref<32x96xf32, #tpu.memory_space<vmem>>, vector<32x96xf32>,
    } else {
    }
    %c0 = arith.constant 0 : index
    %c0_1 = arith.constant 0 : index
    %3 = vector.load %arg11[%c0, %c0_1] : memref<32x96xf32, #tpu.memory_space<vmem>>, vector<32x96xf32>
    %c0_2 = arith.constant 0 : index
    %c0_3 = arith.constant 0 : index
    %4 = vector.load %arg2[%c0_2, %c0_3] : memref<32x32xf32, #tpu.memory_space<vmem>>, vector<32x32xf32>
    %c0_4 = arith.constant 0 : index
    %c0_5 = arith.constant 0 : index
    %5 = vector.load %arg3[%c0_4, %c0_5] : memref<32x96xf32, #tpu.memory_space<vmem>>, vector<32x96xf32>
    %cst = arith.constant dense<0.000000e+00> : vector<32x96xf32>
    %6 = tpu.matmul %4, %5, %cst {dimension_numbers = #tpu.dot_dimension_numbers<[1], [0], [0], [1], [0, 0, 1, 1], [], []>} : vector<32x32xf32>, vector<32x96xf32>, vector<32x96xf32> -> vector<32x96xf32>
    %7 = arith.addf %3, %6 : vector<32x96xf32>
    %c0_6 = arith.constant 0 : index
    %c0_7 = arith.constant 0 : index
    %8 = vector.load %arg11[%c0_6, %c0_7] : memref<32x96xf32, #tpu.memory_space<vmem>>, vector<32x96xf32>
    tpu.vector_store %arg11[%c0_6, %c0_7], %7 {strides = array<i32>} : memref<32x96xf32, #tpu.memory_space<vmem>>, vector<32x96xf32>,
    %c0_i32_8 = arith.constant 0 : i32
    %9 = arith.cmpi eq, %arg1, %c0_i32_8 : i32
    %10 = arith.extui %9 : i1 to i32
    %c0_i32_9 = arith.constant 0 : i32
    %11 = arith.cmpi ne, %10, %c0_i32_9 : i32
    scf.if %11 {
      %c0_10 = arith.constant 0 : index
      %c0_11 = arith.constant 0 : index
      %12 = vector.load %arg11[%c0_10, %c0_11] : memref<32x96xf32, #tpu.memory_space<vmem>>, vector<32x96xf32>
      %13 = vector.extract_strided_slice %12 {offsets = [0, 0], sizes = [32, 32], strides = [1, 1]} : vector<32x96xf32> to vector<32x32xf32>
      %14 = vector.extract_strided_slice %12 {offsets = [0, 32], sizes = [32, 32], strides = [1, 1]} : vector<32x96xf32> to vector<32x32xf32>
      %15 = vector.extract_strided_slice %12 {offsets = [0, 64], sizes = [32, 32], strides = [1, 1]} : vector<32x96xf32> to vector<32x32xf32>
      %c0_12 = arith.constant 0 : index
      %c0_13 = arith.constant 0 : index
      %16 = vector.load %arg4[%c0_12, %c0_13] : memref<1x32xf32, #tpu.memory_space<vmem>>, vector<1x32xf32>
      %c0_14 = arith.constant 0 : index
      %c0_15 = arith.constant 0 : index
      %17 = vector.load %arg5[%c0_14, %c0_15] : memref<1x32xf32, #tpu.memory_space<vmem>>, vector<1x32xf32>
      %cst_16 = arith.constant dense<0.000000e+00> : vector<32xf32>
      %18 = vector.multi_reduction <add>, %13, %cst_16 [1] : vector<32x32xf32> to vector<32xf32>
      %19 = vector.shape_cast %18 : vector<32xf32> to vector<32x1xf32>
      %cst_17 = arith.constant 3.200000e+01 : f32
      %20 = vector.broadcast %cst_17 : f32 to vector<32x1xf32>
      %21 = arith.divf %19, %20 : vector<32x1xf32>
      %22 = vector.broadcast %21 : vector<32x1xf32> to vector<32x32xf32>
      %23 = arith.subf %13, %22 : vector<32x32xf32>
      %24 = arith.mulf %23, %23 : vector<32x32xf32>
      %cst_18 = arith.constant dense<0.000000e+00> : vector<32xf32>
      %25 = vector.multi_reduction <add>, %24, %cst_18 [1] : vector<32x32xf32> to vector<32xf32>
      %26 = vector.shape_cast %25 : vector<32xf32> to vector<32x1xf32>
      %cst_19 = arith.constant 3.200000e+01 : f32
      %27 = vector.broadcast %cst_19 : f32 to vector<32x1xf32>
      %28 = arith.divf %26, %27 : vector<32x1xf32>
      %29 = vector.broadcast %21 : vector<32x1xf32> to vector<32x32xf32>
      %30 = arith.subf %13, %29 : vector<32x32xf32>
      %cst_20 = arith.constant 9.99999974E-6 : f32
      %31 = vector.broadcast %cst_20 : f32 to vector<32x1xf32>
      %32 = arith.addf %28, %31 : vector<32x1xf32>
      %33 = math.rsqrt %32 : vector<32x1xf32>
      %34 = vector.broadcast %33 : vector<32x1xf32> to vector<32x32xf32>
      %35 = arith.mulf %30, %34 : vector<32x32xf32>
      %36 = vector.broadcast %16 : vector<1x32xf32> to vector<32x32xf32>
      %37 = arith.mulf %35, %36 : vector<32x32xf32>
      %38 = vector.broadcast %17 : vector<1x32xf32> to vector<32x32xf32>
      %39 = arith.addf %37, %38 : vector<32x32xf32>
      %c0_21 = arith.constant 0 : index
      %c0_22 = arith.constant 0 : index
      %40 = vector.load %arg8[%c0_21, %c0_22] : memref<32x32xf32, #tpu.memory_space<vmem>>, vector<32x32xf32>
      tpu.vector_store %arg8[%c0_21, %c0_22], %39 {strides = array<i32>} : memref<32x32xf32, #tpu.memory_space<vmem>>, vector<32x32xf32>,
      %c0_23 = arith.constant 0 : index
      %c0_24 = arith.constant 0 : index
      %41 = vector.load %arg6[%c0_23, %c0_24] : memref<1x32xf32, #tpu.memory_space<vmem>>, vector<1x32xf32>
      %c0_25 = arith.constant 0 : index
      %c0_26 = arith.constant 0 : index
      %42 = vector.load %arg7[%c0_25, %c0_26] : memref<1x32xf32, #tpu.memory_space<vmem>>, vector<1x32xf32>
      %cst_27 = arith.constant dense<0.000000e+00> : vector<32xf32>
      %43 = vector.multi_reduction <add>, %14, %cst_27 [1] : vector<32x32xf32> to vector<32xf32>
      %44 = vector.shape_cast %43 : vector<32xf32> to vector<32x1xf32>
      %cst_28 = arith.constant 3.200000e+01 : f32
      %45 = vector.broadcast %cst_28 : f32 to vector<32x1xf32>
      %46 = arith.divf %44, %45 : vector<32x1xf32>
      %47 = vector.broadcast %46 : vector<32x1xf32> to vector<32x32xf32>
      %48 = arith.subf %14, %47 : vector<32x32xf32>
      %49 = arith.mulf %48, %48 : vector<32x32xf32>
      %cst_29 = arith.constant dense<0.000000e+00> : vector<32xf32>
      %50 = vector.multi_reduction <add>, %49, %cst_29 [1] : vector<32x32xf32> to vector<32xf32>
      %51 = vector.shape_cast %50 : vector<32xf32> to vector<32x1xf32>
      %cst_30 = arith.constant 3.200000e+01 : f32
      %52 = vector.broadcast %cst_30 : f32 to vector<32x1xf32>
      %53 = arith.divf %51, %52 : vector<32x1xf32>
      %54 = vector.broadcast %46 : vector<32x1xf32> to vector<32x32xf32>
      %55 = arith.subf %14, %54 : vector<32x32xf32>
      %cst_31 = arith.constant 9.99999974E-6 : f32
      %56 = vector.broadcast %cst_31 : f32 to vector<32x1xf32>
      %57 = arith.addf %53, %56 : vector<32x1xf32>
      %58 = math.rsqrt %57 : vector<32x1xf32>
      %59 = vector.broadcast %58 : vector<32x1xf32> to vector<32x32xf32>
      %60 = arith.mulf %55, %59 : vector<32x32xf32>
      %61 = vector.broadcast %41 : vector<1x32xf32> to vector<32x32xf32>
      %62 = arith.mulf %60, %61 : vector<32x32xf32>
      %63 = vector.broadcast %42 : vector<1x32xf32> to vector<32x32xf32>
      %64 = arith.addf %62, %63 : vector<32x32xf32>
      %c0_32 = arith.constant 0 : index
      %c0_33 = arith.constant 0 : index
      %65 = vector.load %arg9[%c0_32, %c0_33] : memref<32x32xf32, #tpu.memory_space<vmem>>, vector<32x32xf32>
      tpu.vector_store %arg9[%c0_32, %c0_33], %64 {strides = array<i32>} : memref<32x32xf32, #tpu.memory_space<vmem>>, vector<32x32xf32>,
      %c0_34 = arith.constant 0 : index
      %c0_35 = arith.constant 0 : index
      %66 = vector.load %arg10[%c0_34, %c0_35] : memref<32x32xf32, #tpu.memory_space<vmem>>, vector<32x32xf32>
      tpu.vector_store %arg10[%c0_34, %c0_35], %15 {strides = array<i32>} : memref<32x32xf32, #tpu.memory_space<vmem>>, vector<32x32xf32>,
    } else {
    }
    return
  }
  func.func @transform_0(%arg0: i32, %arg1: i32) -> (i32, i32) {
    %c0_i32 = arith.constant 0 : i32
    return %arg0, %arg1 : i32, i32
  }
  func.func @transform_1(%arg0: i32, %arg1: i32) -> (i32, i32) {
    %c0_i32 = arith.constant 0 : i32
    %c0_i32_0 = arith.constant 0 : i32
    return %arg1, %c0_i32 : i32, i32
  }
  func.func @transform_2(%arg0: i32, %arg1: i32) -> (i32, i32) {
    %c0_i32 = arith.constant 0 : i32
    %c0_i32_0 = arith.constant 0 : i32
    %c0_i32_1 = arith.constant 0 : i32
    return %c0_i32, %c0_i32_0 : i32, i32
  }
  func.func @transform_3(%arg0: i32, %arg1: i32) -> (i32, i32) {
    %c0_i32 = arith.constant 0 : i32
    %c0_i32_0 = arith.constant 0 : i32
    %c0_i32_1 = arith.constant 0 : i32
    return %c0_i32, %c0_i32_0 : i32, i32
  }
  func.func @transform_4(%arg0: i32, %arg1: i32) -> (i32, i32) {
    %c0_i32 = arith.constant 0 : i32
    %c0_i32_0 = arith.constant 0 : i32
    %c0_i32_1 = arith.constant 0 : i32
    return %c0_i32, %c0_i32_0 : i32, i32
  }
  func.func @transform_5(%arg0: i32, %arg1: i32) -> (i32, i32) {
    %c0_i32 = arith.constant 0 : i32
    %c0_i32_0 = arith.constant 0 : i32
    %c0_i32_1 = arith.constant 0 : i32
    return %c0_i32, %c0_i32_0 : i32, i32
  }
  func.func @transform_6(%arg0: i32, %arg1: i32) -> (i32, i32) {
    %c0_i32 = arith.constant 0 : i32
    %c0_i32_0 = arith.constant 0 : i32
    return %arg0, %c0_i32 : i32, i32
  }
  func.func @transform_7(%arg0: i32, %arg1: i32) -> (i32, i32) {
    %c0_i32 = arith.constant 0 : i32
    %c0_i32_0 = arith.constant 0 : i32
    return %arg0, %c0_i32 : i32, i32
  }
  func.func @transform_8(%arg0: i32, %arg1: i32) -> (i32, i32) {
    %c0_i32 = arith.constant 0 : i32
    %c0_i32_0 = arith.constant 0 : i32
    return %arg0, %c0_i32 : i32, i32
  }
}

</mosaic_0001>

<bundles_post_ra>
// kernel: tpu_custom_call.1
= control target key start
LH: loop header
LB: loop body
LE: loop exit
PB: predicated region body
PF: predicated region fallthrough
CT: control target
= control target key end

     0   :  { %14 = vsyncpa [#allocation4], 0  ;;  %s919_s0 = inlined_call_operand.hbm [shape: f32[32,32], index: 0, kind: input, shape index: {}]   ;;  %s920_s1 = inlined_call_operand.hbm [shape: f32[32,96], index: 1, kind: input, shape index: {}]   ;;  %s921_s2 = inlined_call_operand.vmem [shape: f32[1,32], index: 2, kind: input, shape index: {}]   ;;  %s922_s3 = inlined_call_operand.vmem [shape: f32[1,32], index: 3, kind: input, shape index: {}]   ;;  %s923_s4 = inlined_call_operand.vmem [shape: f32[1,32], index: 4, kind: input, shape index: {}]   ;;  %s924_s5 = inlined_call_operand.vmem [shape: f32[1,32], index: 5, kind: input, shape index: {}]   ;;  %s925_s6 = inlined_call_operand.hbm [shape: f32[32,32], index: 6, kind: output, shape index: {0}]   ;;  %s926_s7 = inlined_call_operand.hbm [shape: f32[32,32], index: 7, kind: output, shape index: {1}]   ;;  %s927_s8 = inlined_call_operand.hbm [shape: f32[32,32], index: 8, kind: output, shape index: {2}]  }
   0x1   :  { %15 = vsyncpa [#allocation7], 0 }
   0x2   :  { %16 = vsyncpa [#allocation5], 0 }
   0x3   :  { %17 = vsyncpa [#allocation10], 0  ;;  %s652_s27 = smov [#allocation3]   ;;  %s534_s9 = scalar_lea.hbm %s919_s0, 512 }
   0x4   :  { %s23_s28 = sshll.u32 %s652_s27, 4  ;;  %p535_p0 = scmp.ne.s32.totalorder %s919_s0, %s534_s9  ;;  %s24_s28 = int_to_ptr.vmem [resolvable:$true] %s23_s28 }
   0x5   :  { %p538_p1 = scmp.lt.u32.totalorder %s534_s9, %s919_s0 }
   0x7   :  { %p540_p2 = pnand %p538_p1, %p535_p0 }
   0x9   :  { %543 = shalt.err (!%p540_p2)
}
   0xa   :  { %s544_s14 = scalar_lea.vmem %s24_s28, 512  ;;  %p549_p4 = scmp.lt.s32.totalorder %s24_s28, %s24_s28 }
   0xb   :  { %p545_p3 = scmp.ne.s32.totalorder %s24_s28, %s544_s14  ;;  %p550_p5 = scmp.lt.s32.totalorder %s544_s14, %s544_s14 }
   0xd   :  { %p551_p6 = por %p550_p5, %p549_p4 }
   0xf   :  { %p552_p7 = pnand %p551_p6, %p545_p3 }
  0x11   :  { %555 = shalt.err (!%p552_p7)
}
  0x12   :  { %s653_s15 = smov 128   ;;  %s654_s16 = smov 8  }
  0x13   :  { %29 = dma.hbm_to_vmem [thread:$0]  %s919_s0, 512, %s24_s28, [#allocation4], %s653_s15, %s653_s15, %s654_s16  }
  0x14   :  { %s655_s19 = smov [#allocation6]   ;;  %s556_s23 = scalar_lea.hbm %s920_s1, 512 }
  0x15   :  { %s35_s20 = sshll.u32 %s655_s19, 4  ;;  %p557_p8 = scmp.ne.s32.totalorder %s920_s1, %s556_s23  ;;  %s36_s20 = int_to_ptr.vmem [resolvable:$true] %s35_s20 }
  0x16   :  { %p560_p9 = scmp.lt.u32.totalorder %s556_s23, %s920_s1 }
  0x18   :  { %p562_p10 = pnand %p560_p9, %p557_p8 }
  0x1a   :  { %565 = shalt.err (!%p562_p10)
}
  0x1b   :  { %s566_s29 = scalar_lea.vmem %s36_s20, 512  ;;  %p571_p12 = scmp.lt.s32.totalorder %s36_s20, %s36_s20 }
  0x1c   :  { %p567_p11 = scmp.ne.s32.totalorder %s36_s20, %s566_s29  ;;  %p572_p13 = scmp.lt.s32.totalorder %s566_s29, %s566_s29 }
  0x1e   :  { %p573_p0 = por %p572_p13, %p571_p12 }
  0x20   :  { %p574_p1 = pnand %p573_p0, %p567_p11 }
  0x22   :  { %577 = shalt.err (!%p574_p1)
}
  0x23   :  { %41 = dma.hbm_to_vmem [thread:$0]  %s920_s1, 512, %s36_s20, [#allocation7], %s653_s15, %s653_s15, %s654_s16  }
  0x24   :  { %644 = dma.done.wait [#allocation4], 512  }
  0x25   :  { %645 = vsyncadd [#allocation4], 4294966784 }
  0x26   :  { %646 = dma.done.wait [#allocation7], 512  }
  0x27   :  { %647 = vsyncadd [#allocation7], 4294966784  ;;  %vm60_vm0 = vcmask 785408   ;;  %v656_v0 = vmov 0.0   ;;  %vm77_vm1 = vcmask 261120   ;;  %v73_v1 = vld [vmem:[#allocation6] sm:$0xff] }
  0x28   :  { %62 = vst.msk [vmem:[#allocation2 + $0x8] sm:$0xff] %vm60_vm0, %v656_v0  ;;  %61 = vst.msk [vmem:[#allocation2] sm:$0xff] %vm60_vm0, %v656_v0  ;;  %v74_v2 = vld [vmem:[#allocation6 + $0x8] sm:$0xff]  ;;  %v75_v3 = vld [vmem:[#allocation6 + $0x10] sm:$0xff]  ;;  %s657_s1 = smov 96   ;;  %s658_s10 = smov 32  }
  0x29   :  { %63 = vst.msk [vmem:[#allocation2 + $0x10] sm:$0xff] %vm60_vm0, %v656_v0  ;;  %64 = vst.msk [vmem:[#allocation2 + $0x18] sm:$0xff] %vm60_vm0, %v656_v0  ;;  %v495_v4 = vpack.c.bf16 %v74_v2, %v73_v1  ;;  %v76_v5 = vld [vmem:[#allocation6 + $0x18] sm:$0xff]  ;;  %v69_v6 = vld [vmem:[#allocation3] sm:$0xff] }
  0x2a   :  { %v71_v7 = vld [vmem:[#allocation3 + $0x10] sm:$0xff]  ;;  %v499_v8 = vpack.c.bf16 %v76_v5, %v75_v3  ;;  %489 = vmatprep.mubr.msk.f32.mxu0 %vm77_vm1, %v69_v6  ;;  %v70_v9 = vld [vmem:[#allocation3 + $0x8] sm:$0xff]  ;;  %v72_v10 = vld [vmem:[#allocation3 + $0x18] sm:$0xff] }
  0x2b   :  { %492 = vmatprep.mubr.msk.f32.mxu1 %vm77_vm1, %v71_v7  ;;  %496 = vmatprep.subr.bf16.mxu0 %v495_v4  ;;  %v471_v63 = vld [vmem:[%s923_s4] ss:$0 sm:$0xff]  ;;  %s659_s4 = smov 64  }
  0x2c   :  { %503 = vmatprep.subr.bf16.mxu1 %v495_v4  ;;  %498 = vmatpush3.bf16.msra.mxu0 %v495_v4  ;;  %v472_v0 = vld [vmem:[%s924_s5] ss:$0 sm:$0xff] }
  0x2d   :  { %505 = vmatpush3.bf16.msra.mxu1 %v495_v4  ;;  %500 = vmatprep.subr.bf16.mxu0 %v499_v8 }
  0x2e   :  { %504 = vmatprep.subr.bf16.mxu1 %v499_v8 }
  0x2f   :  { %v66_v11 = vld [vmem:[#allocation2 + $0x8] sm:$0xff]  ;;  %v65_v13 = vld [vmem:[#allocation2] sm:$0xff] }
  0x30   :  { %502 = vmatpush3.bf16.msra.mxu0 %v499_v8  ;;  %v68_v12 = vld [vmem:[#allocation2 + $0x18] sm:$0xff]  ;;  %v67_v14 = vld [vmem:[#allocation2 + $0x10] sm:$0xff] }
  0x31   :  { %506 = vmatpush3.bf16.msra.mxu1 %v499_v8 }
  0x33   :  { %490 = vmatmul.mubr.msk.f32.vlgmr.msra.gmra.mrb[0].mxu0 %vm77_vm1, %v70_v9 }
  0x34   :  { %493 = vmatmul.mubr.msk.f32.vlgmr.msra.gmra.mrb[0].mxu1 %vm77_vm1, %v72_v10 }
 0x106   :  { %v491_v15 = vpop.f32.mrb[0].mxu0 }
 0x107   :  { %v494_v16 = vpop.f32.mrb[0].mxu1  ;;  %v176_v17 = vadd.f32 %v491_v15, %v66_v11  ;;  %v156_v19 = vpop.f32.mrb[1].mxu0 }
 0x108   :  { %v178_v18 = vadd.f32 %v494_v16, %v68_v12  ;;  %v166_v20 = vpop.f32.mrb[1].mxu1  ;;  %v175_v21 = vadd.f32 %v156_v19, %v65_v13 }
 0x109   :  { %v177_v22 = vadd.f32 %v166_v20, %v67_v14  ;;  %181 = vst.msk [vmem:[#allocation2 + $0x8] sm:$0xff] %vm60_vm0, %v176_v17 }
 0x10a   :  { %183 = vst.msk [vmem:[#allocation2 + $0x18] sm:$0xff] %vm60_vm0, %v178_v18  ;;  %180 = vst.msk [vmem:[#allocation2] sm:$0xff] %vm60_vm0, %v175_v21 }
 0x10b   :  { %182 = vst.msk [vmem:[#allocation2 + $0x10] sm:$0xff] %vm60_vm0, %v177_v22 }
 0x110   :  { %v760_v26 = vld [vmem:[#allocation2 + $0x8] sm:$0xff] }
 0x111   :  { %v752_v24 = vld [vmem:[#allocation2] sm:$0xff]  ;;  %v758_v25 = vld [vmem:[#allocation2 + $0x18] sm:$0xff]  ;;  %v196_v54 = vsel %vm77_vm1, %v760_v26, 0.0 }
 0x112   :  { %v750_v23 = vld [vmem:[#allocation2 + $0x10] sm:$0xff]  ;;  %276 = vrot.lane.b32.xlu0 %v752_v24, %s657_s1  ;;  %v193_v51 = vsel %vm77_vm1, %v752_v24, 0.0  ;;  %v202_v53 = vsel %vm77_vm1, %v758_v25, 0.0 }
 0x113   :  { %280 = vrot.lane.b32.xlu1 %v750_v23, %s657_s1  ;;  %v199_v52 = vsel %vm77_vm1, %v750_v23, 0.0 }
 0x116   :  { %278 = vrot.lane.b32.xlu0 %v760_v26, %s657_s1 }
 0x117   :  { %282 = vrot.lane.b32.xlu1 %v758_v25, %s657_s1 }
 0x184   :  { %v277_v28 = vpop.permute.xlu0 %276 }
 0x185   :  { %v281_v27 = vpop.permute.xlu1 %280  ;;  %v288_v29 = vsel %vm77_vm1, %v277_v28, 0.0 }
 0x186   :  { %289 = vadd.xlane.f32.xlu0 %v288_v29  ;;  %v294_v30 = vsel %vm77_vm1, %v281_v27, 0.0 }
 0x188   :  { %v279_v31 = vpop.permute.xlu0 %278 }
 0x189   :  { %v291_v32 = vsel %vm77_vm1, %v279_v31, 0.0  ;;  %v283_v33 = vpop.permute.xlu1 %282 }
 0x18a   :  { %295 = vadd.xlane.f32.xlu0 %v294_v30  ;;  %292 = vadd.xlane.f32.xlu1 %v291_v32  ;;  %v297_v34 = vsel %vm77_vm1, %v283_v33, 0.0 }
 0x18e   :  { %298 = vadd.xlane.f32.xlu0 %v297_v34 }
 0x213   :  { %v290_v35 = vpop.xlane.xlu0 %289 }
 0x214   :  { %v300_v36 = vmul.f32 0.03125, %v290_v35 }
 0x216   :  { %v771_v37 = vsub.f32 %v752_v24, %v300_v36 }
 0x217   :  { %v293_v38 = vpop.xlane.xlu1 %292  ;;  %v296_v39 = vpop.xlane.xlu0 %295 }
 0x218   :  { %v301_v40 = vmul.f32 0.03125, %v293_v38  ;;  %v302_v41 = vmul.f32 0.03125, %v296_v39  ;;  %v308_v42 = vmul.f32 %v771_v37, %v771_v37 }
 0x21a   :  { %v776_v43 = vsub.f32 %v760_v26, %v301_v40  ;;  %v779_v44 = vsub.f32 %v750_v23, %v302_v41  ;;  %316 = vrot.lane.b32.xlu1 %v308_v42, %s657_s1 }
 0x21b   :  { %v299_v45 = vpop.xlane.xlu0 %298 }
 0x21c   :  { %v303_v46 = vmul.f32 0.03125, %v299_v45  ;;  %v309_v47 = vmul.f32 %v776_v43, %v776_v43  ;;  %v310_v48 = vmul.f32 %v779_v44, %v779_v44 }
 0x21e   :  { %v787_v49 = vsub.f32 %v758_v25, %v303_v46  ;;  %318 = vrot.lane.b32.xlu0 %v309_v47, %s657_s1  ;;  %320 = vrot.lane.b32.xlu1 %v310_v48, %s657_s1 }
 0x220   :  { %v311_v50 = vmul.f32 %v787_v49, %v787_v49 }
 0x222   :  { %322 = vrot.lane.b32.xlu1 %v311_v50, %s657_s1 }
 0x23d   :  { %194 = vadd.xlane.f32.xlu0 %v193_v51 }
 0x241   :  { %200 = vadd.xlane.f32.xlu0 %v199_v52 }
 0x245   :  { %203 = vadd.xlane.f32.xlu0 %v202_v53 }
 0x246   :  { %197 = vadd.xlane.f32.xlu1 %v196_v54 }
 0x28c   :  { %v317_v55 = vpop.permute.xlu1 %316 }
 0x28d   :  { %v328_v56 = vsel %vm77_vm1, %v317_v55, 0.0 }
 0x28e   :  { %329 = vadd.xlane.f32.xlu1 %v328_v56 }
 0x290   :  { %v321_v57 = vpop.permute.xlu1 %320  ;;  %v319_v58 = vpop.permute.xlu0 %318 }
 0x291   :  { %v334_v59 = vsel %vm77_vm1, %v321_v57, 0.0  ;;  %v331_v60 = vsel %vm77_vm1, %v319_v58, 0.0 }
 0x292   :  { %335 = vadd.xlane.f32.xlu1 %v334_v59  ;;  %332 = vadd.xlane.f32.xlu0 %v331_v60 }
 0x294   :  { %v323_v61 = vpop.permute.xlu1 %322 }
 0x295   :  { %v337_v62 = vsel %vm77_vm1, %v323_v61, 0.0 }
 0x296   :  { %338 = vadd.xlane.f32.xlu0 %v337_v62 }
 0x2a3   :  { %361 = vrot.lane.b32.xlu1 %v471_v63, %s658_s10 }
 0x2ac   :  { %373 = vrot.lane.b32.xlu0 %v472_v0, %s658_s10 }
 0x2ca   :  { %v195_v1 = vpop.xlane.xlu0 %194 }
 0x2cb   :  { %v206_v2 = vmul.f32 0.03125, %v195_v1 }
 0x2cd   :  { %v813_v3 = vsub.f32 %v752_v24, %v206_v2 }
 0x2ce   :  { %v201_v4 = vpop.xlane.xlu0 %200 }
 0x2cf   :  { %v208_v5 = vmul.f32 0.03125, %v201_v4  ;;  %v214_v6 = vmul.f32 %v813_v3, %v813_v3 }
 0x2d1   :  { %v818_v7 = vsub.f32 %v750_v23, %v208_v5  ;;  %v218_v8 = vsel %vm77_vm1, %v214_v6, 0.0  ;;  %v470_v5 = vld [vmem:[%s922_s3] ss:$0 sm:$0xff] }
 0x2d2   :  { %219 = vadd.xlane.f32.xlu1 %v218_v8  ;;  %v204_v9 = vpop.xlane.xlu0 %203 }
 0x2d3   :  { %v209_v10 = vmul.f32 0.03125, %v204_v9  ;;  %v198_v11 = vpop.xlane.xlu1 %197  ;;  %v216_v12 = vmul.f32 %v818_v7, %v818_v7 }
 0x2d4   :  { %v207_v13 = vmul.f32 0.03125, %v198_v11 }
 0x2d5   :  { %v224_v14 = vsel %vm77_vm1, %v216_v12, 0.0  ;;  %v825_v15 = vsub.f32 %v758_v25, %v209_v10 }
 0x2d6   :  { %v828_v16 = vsub.f32 %v760_v26, %v207_v13  ;;  %225 = vadd.xlane.f32.xlu1 %v224_v14 }
 0x2d7   :  { %v217_v19 = vmul.f32 %v825_v15, %v825_v15 }
 0x2d8   :  { %v215_v17 = vmul.f32 %v828_v16, %v828_v16 }
 0x2d9   :  { %v227_v20 = vsel %vm77_vm1, %v217_v19, 0.0 }
 0x2da   :  { %v221_v18 = vsel %vm77_vm1, %v215_v17, 0.0 }
 0x2db   :  { %222 = vadd.xlane.f32.xlu0 %v221_v18 }
 0x2df   :  { %228 = vadd.xlane.f32.xlu0 %v227_v20 }
 0x2e7   :  { %402 = vrot.lane.b32.xlu1 %v760_v26, %s659_s4 }
 0x2f5   :  { %400 = vrot.lane.b32.xlu0 %v752_v24, %s659_s4 }
 0x31b   :  { %v330_v21 = vpop.xlane.xlu1 %329 }
 0x31c   :  { %v340_v22 = vmul.f32 0.03125, %v330_v21 }
 0x31e   :  { %v344_v30 = vadd.f32 1e-05, %v340_v22 }
 0x31f   :  { %v336_v27 = vpop.xlane.xlu1 %335  ;;  %v333_v28 = vpop.xlane.xlu0 %332 }
 0x320   :  { %v341_v29 = vmul.f32 0.03125, %v333_v28  ;;  %v342_v31 = vmul.f32 0.03125, %v336_v27 }
 0x322   :  { %v345_v32 = vadd.f32 1e-05, %v341_v29  ;;  %v346_v35 = vadd.f32 1e-05, %v342_v31 }
 0x323   :  { %v339_v33 = vpop.xlane.xlu0 %338  ;;  %v362_v39 = vpop.permute.xlu1 %361 }
 0x324   :  { %v343_v34 = vmul.f32 0.03125, %v339_v33  ;;  %518 = vrsqrt.f32 %v345_v32 }
 0x325   :  { %520 = vrsqrt.f32 %v344_v30 }
 0x326   :  { %v347_v36 = vadd.f32 1e-05, %v343_v34 }
 0x327   :  { %v374_v46 = vpop.permute.xlu0 %373 }
 0x328   :  { %522 = vrsqrt.f32 %v347_v36 }
 0x329   :  { %524 = vrsqrt.f32 %v346_v35 }
 0x32e   :  { %v519_v26 = vpop.eup %518 }
 0x32f   :  { %v521_v38 = vpop.eup %520  ;;  %v353_v24 = vmul.f32 %v519_v26, %v776_v43 }
 0x330   :  { %v352_v42 = vmul.f32 %v521_v38, %v771_v37 }
 0x331   :  { %v365_v41 = vmul.f32 %v362_v39, %v353_v24 }
 0x332   :  { %v523_v40 = vpop.eup %522  ;;  %v364_v52 = vmul.f32 %v362_v39, %v352_v42 }
 0x333   :  { %v355_v45 = vmul.f32 %v523_v40, %v787_v49  ;;  %v525_v47 = vpop.eup %524  ;;  %v377_v48 = vadd.f32 %v374_v46, %v365_v41 }
 0x334   :  { %v354_v51 = vmul.f32 %v525_v47, %v779_v44  ;;  %v376_v54 = vadd.f32 %v374_v46, %v364_v52 }
 0x335   :  { %v367_v50 = vmul.f32 %v362_v39, %v355_v45  ;;  %386 = vrot.lane.b32.xlu0 %v377_v48, %s657_s1 }
 0x336   :  { %v366_v43 = vmul.f32 %v362_v39, %v354_v51 }
 0x337   :  { %v379_v53 = vadd.f32 %v374_v46, %v367_v50 }
 0x338   :  { %v378_v37 = vadd.f32 %v374_v46, %v366_v43 }
 0x339   :  { %390 = vrot.lane.b32.xlu1 %v379_v53, %s657_s1  ;;  %404 = vrot.lane.b32.xlu0 %v750_v23, %s659_s4 }
 0x33d   :  { %384 = vrot.lane.b32.xlu1 %v376_v54, %s657_s1 }
 0x341   :  { %388 = vrot.lane.b32.xlu1 %v378_v37, %s657_s1 }
 0x345   :  { %406 = vrot.lane.b32.xlu1 %v758_v25, %s659_s4  ;;  %v469_v25 = vld [vmem:[%s921_s2] ss:$0 sm:$0xff]  ;;  %s660_s2 = smov [#allocation8]  }
 0x346   :  { %s421_s3 = sshll.u32 %s660_s2, 4  ;;  %s422_s3 = int_to_ptr.vmem [resolvable:$true] %s421_s3 }
 0x347   :  { %s578_s18 = scalar_lea.vmem %s422_s3, 512  ;;  %p583_p3 = scmp.lt.s32.totalorder %s422_s3, %s422_s3 }
 0x348   :  { %p579_p2 = scmp.ne.s32.totalorder %s422_s3, %s578_s18  ;;  %p584_p4 = scmp.lt.s32.totalorder %s578_s18, %s578_s18 }
 0x34a   :  { %p585_p5 = por %p584_p4, %p583_p3 }
 0x34c   :  { %p586_p6 = pnand %p585_p5, %p579_p2 }
 0x35f   :  { %v220_v49 = vpop.xlane.xlu1 %219 }
 0x360   :  { %v230_v55 = vmul.f32 0.03125, %v220_v49 }
 0x362   :  { %v234_v44 = vadd.f32 1e-05, %v230_v55 }
 0x363   :  { %v226_v56 = vpop.xlane.xlu1 %225 }
 0x364   :  { %526 = vrsqrt.f32 %v234_v44  ;;  %v232_v57 = vmul.f32 0.03125, %v226_v56 }
 0x366   :  { %v236_v58 = vadd.f32 1e-05, %v232_v57 }
 0x367   :  { %v403_v59 = vpop.permute.xlu1 %402 }
 0x368   :  { %528 = vrsqrt.f32 %v236_v58  ;;  %413 = vst.msk [vmem:[#allocation11 + $0x8] sm:$0xff] %vm77_vm1, %v403_v59  ;;  %v223_v23 = vpop.xlane.xlu0 %222 }
 0x369   :  { %v231_v60 = vmul.f32 0.03125, %v223_v23 }
 0x36b   :  { %v235_v61 = vadd.f32 1e-05, %v231_v60 }
 0x36c   :  { %v229_v62 = vpop.xlane.xlu0 %228 }
 0x36d   :  { %530 = vrsqrt.f32 %v235_v61  ;;  %v233_v63 = vmul.f32 0.03125, %v229_v62 }
 0x36e   :  { %v527_v0 = vpop.eup %526 }
 0x36f   :  { %v242_v1 = vmul.f32 %v527_v0, %v813_v3  ;;  %v237_v2 = vadd.f32 1e-05, %v233_v63 }
 0x370   :  { %v401_v4 = vpop.permute.xlu0 %400 }
 0x371   :  { %v252_v6 = vmul.f32 %v469_v25, %v242_v1  ;;  %532 = vrsqrt.f32 %v237_v2  ;;  %412 = vst.msk [vmem:[#allocation11] sm:$0xff] %vm77_vm1, %v401_v4 }
 0x372   :  { %v529_v8 = vpop.eup %528 }
 0x373   :  { %v244_v9 = vmul.f32 %v529_v8, %v818_v7  ;;  %v262_v10 = vadd.f32 %v470_v5, %v252_v6 }
 0x375   :  { %v254_v11 = vmul.f32 %v469_v25, %v244_v9  ;;  %266 = vst.msk [vmem:[#allocation8] sm:$0xff] %vm77_vm1, %v262_v10 }
 0x377   :  { %v531_v12 = vpop.eup %530  ;;  %v264_v13 = vadd.f32 %v470_v5, %v254_v11 }
 0x378   :  { %v243_v3 = vmul.f32 %v531_v12, %v828_v16 }
 0x379   :  { %268 = vst.msk [vmem:[#allocation8 + $0x10] sm:$0xff] %vm77_vm1, %v264_v13 }
 0x37a   :  { %v253_v14 = vmul.f32 %v469_v25, %v243_v3 }
 0x37b   :  { %v533_v17 = vpop.eup %532 }
 0x37c   :  { %v245_v18 = vmul.f32 %v533_v17, %v825_v15  ;;  %v263_v19 = vadd.f32 %v470_v5, %v253_v14 }
 0x37e   :  { %v255_v20 = vmul.f32 %v469_v25, %v245_v18  ;;  %267 = vst.msk [vmem:[#allocation8 + $0x8] sm:$0xff] %vm77_vm1, %v263_v19 }
 0x380   :  { %v265_v7 = vadd.f32 %v470_v5, %v255_v20 }
 0x382   :  { %269 = vst.msk [vmem:[#allocation8 + $0x18] sm:$0xff] %vm77_vm1, %v265_v7 }
 0x383   :  { %589 = shalt.err (!%p586_p6)
}
 0x384   :  { %s590_s21 = scalar_lea.hbm %s925_s6, 512 }
 0x385   :  { %p591_p7 = scmp.ne.s32.totalorder %s925_s6, %s590_s21  ;;  %p594_p8 = scmp.lt.u32.totalorder %s590_s21, %s925_s6 }
 0x387   :  { %p596_p9 = pnand %p594_p8, %p591_p7 }
 0x389   :  { %599 = shalt.err (!%p596_p9)
}
 0x38a   :  { %427 = dma.vmem_to_hbm [thread:$0]  %s422_s3, 512, %s925_s6, [#allocation5], %s653_s15, %s653_s15, %s654_s16  }
 0x38b   :  { %s661_s29 = smov [#allocation9]   ;;  %s662_s28 = smov [#allocation11]  }
 0x38c   :  { %s433_s0 = sshll.u32 %s661_s29, 4  ;;  %s445_s1 = sshll.u32 %s662_s28, 4  ;;  %s434_s0 = int_to_ptr.vmem [resolvable:$true] %s433_s0  ;;  %s446_s1 = int_to_ptr.vmem [resolvable:$true] %s445_s1 }
 0x38d   :  { %s600_s6 = scalar_lea.vmem %s434_s0, 512  ;;  %p605_p11 = scmp.lt.s32.totalorder %s434_s0, %s434_s0 }
 0x38e   :  { %p601_p10 = scmp.ne.s32.totalorder %s434_s0, %s600_s6  ;;  %p606_p12 = scmp.lt.s32.totalorder %s600_s6, %s600_s6 }
 0x390   :  { %p607_p13 = por %p606_p12, %p605_p11 }
 0x392   :  { %p608_p0 = pnand %p607_p13, %p601_p10 }
 0x3a7   :  { %v387_v15 = vpop.permute.xlu0 %386 }
 0x3a8   :  { %397 = vst.msk [vmem:[#allocation9 + $0x8] sm:$0xff] %vm77_vm1, %v387_v15 }
 0x3ab   :  { %v391_v16 = vpop.permute.xlu1 %390  ;;  %v405_v21 = vpop.permute.xlu0 %404 }
 0x3ac   :  { %399 = vst.msk [vmem:[#allocation9 + $0x18] sm:$0xff] %vm77_vm1, %v391_v16  ;;  %414 = vst.msk [vmem:[#allocation11 + $0x10] sm:$0xff] %vm77_vm1, %v405_v21 }
 0x3af   :  { %v385_v22 = vpop.permute.xlu1 %384 }
 0x3b0   :  { %396 = vst.msk [vmem:[#allocation9] sm:$0xff] %vm77_vm1, %v385_v22 }
 0x3b3   :  { %v389_v27 = vpop.permute.xlu1 %388 }
 0x3b4   :  { %398 = vst.msk [vmem:[#allocation9 + $0x10] sm:$0xff] %vm77_vm1, %v389_v27 }
 0x3b5   :  { %611 = shalt.err (!%p608_p0)
}
 0x3b6   :  { %s612_s10 = scalar_lea.hbm %s926_s7, 512 }
 0x3b7   :  { %p613_p1 = scmp.ne.s32.totalorder %s926_s7, %s612_s10  ;;  %p616_p2 = scmp.lt.u32.totalorder %s612_s10, %s926_s7 }
 0x3b9   :  { %p618_p3 = pnand %p616_p2, %p613_p1 }
 0x3bb   :  { %621 = shalt.err (!%p618_p3)
}
 0x3bc   :  { %439 = dma.vmem_to_hbm [thread:$0]  %s434_s0, 512, %s926_s7, [#allocation10], %s653_s15, %s653_s15, %s654_s16   ;;  %v407_v28 = vpop.permute.xlu1 %406 }
 0x3bd   :  { %415 = vst.msk [vmem:[#allocation11 + $0x18] sm:$0xff] %vm77_vm1, %v407_v28  ;;  %s622_s17 = scalar_lea.vmem %s446_s1, 512  ;;  %p627_p5 = scmp.lt.s32.totalorder %s446_s1, %s446_s1 }
 0x3be   :  { %p623_p4 = scmp.ne.s32.totalorder %s446_s1, %s622_s17  ;;  %p628_p6 = scmp.lt.s32.totalorder %s622_s17, %s622_s17 }
 0x3c0   :  { %p629_p7 = por %p628_p6, %p627_p5 }
 0x3c2   :  { %p630_p8 = pnand %p629_p7, %p623_p4 }
 0x3c4   :  { %633 = shalt.err (!%p630_p8)
}
 0x3c5   :  { %s634_s18 = scalar_lea.hbm %s927_s8, 512 }
 0x3c6   :  { %p635_p9 = scmp.ne.s32.totalorder %s927_s8, %s634_s18  ;;  %p638_p10 = scmp.lt.u32.totalorder %s634_s18, %s927_s8 }
 0x3c8   :  { %p640_p11 = pnand %p638_p10, %p635_p9 }
 0x3ca   :  { %643 = shalt.err (!%p640_p11)
}
 0x3cb   :  { %451 = dma.vmem_to_hbm [thread:$0]  %s446_s1, 512, %s927_s8, [#allocation10], %s653_s15, %s653_s15, %s654_s16  }
 0x3cc   :  { %648 = dma.done.wait [#allocation5], 512  }
 0x3cd   :  { %649 = vsyncadd [#allocation5], 4294966784 }
 0x3ce   :  { %650 = dma.done.wait [#allocation10], 1024  }
 0x3cf   :  { %651 = vsyncadd [#allocation10], 4294966272 }
 0x3d0   :  { %461 = vsyncpa [#allocation4], 1 }
 0x3d1   :  { %462 = vsyncpa [#allocation7], 1 }
 0x3d2   :  { %463 = vsyncpa [#allocation5], 1 }
 0x3d3   :  { %464 = vsyncpa [#allocation10], 1 }

</bundles_post_ra>
